<compile_context>
chip_gen: v6e
topology: v6e:2x2x1
jax: 0.10.0
libtpu: 0.0.40
codegen_flags: <defaults>
</compile_context>

<pallas_src>
import jax
import jax.numpy as jnp
from jax.experimental import pallas as pl
from jax.experimental.pallas import tpu as pltpu


def _linear_kernel(x_ref, w_ref, b_ref, o_ref, acc_ref):
    """One (tm, tn) output tile: accumulate over K, add bias in the epilogue."""
    k = pl.program_id(2)

    @pl.when(k == 0)
    def _init():
        acc_ref[...] = jnp.zeros_like(acc_ref)

    # Hot loop: bf16 MXU matmul with f32 accumulation.
    acc_ref[...] += jnp.dot(
        x_ref[...], w_ref[...], preferred_element_type=jnp.float32
    )

    @pl.when(k == pl.num_programs(2) - 1)
    def _finalize():
        # Bias (1, tn) broadcasts over the tm rows; VPU has slack here.
        o_ref[...] = (acc_ref[...] + b_ref[...]).astype(o_ref.dtype)


def _round_up(x, m):
    return ((x + m - 1) // m) * m


def _default_tiles():
    """Per-generation tile sizes (bf16 inputs, f32 accumulator, double-buffered)."""
    try:
        kind = jax.devices()[0].device_kind.lower()
    except Exception:  # pragma: no cover - defensive, keep the kernel usable
        kind = ""
    if "v5" in kind:
        # v5e: 4x128x128 MXU, lower HBM BW -> 128-granular N, deeper K reuse.
        return 256, 128, 512
    if "v6" in kind:
        # v6e: 128 MiB VMEM, 2x256x256 MXU -> large 256-multiple tiles.
        return 512, 512, 512
    # v7x (64 MiB VMEM, 2 TCs/chip) and unknown chips: conservative 256-multiples.
    return 256, 256, 512


def base_model_forward(x, w, b, *, tm=None, tn=None, tk=None):
    """BaseModel.forward(x) == backbone(x) == x @ w + b as a tiled Pallas kernel.

    x: [N, D_in]   (any float dtype; cast to bf16 for the MXU)
    w: [D_in, D_out]
    b: [D_out] or [1, D_out]
    returns: [N, D_out] float32 (f32 accumulation)
    """
    n, d_in = x.shape
    d_in_w, d_out = w.shape
    assert d_in == d_in_w, "x / w inner dims must match"

    dtm, dtn, dtk = _default_tiles()
    tm = tm if tm is not None else dtm
    tn = tn if tn is not None else dtn
    tk = tk if tk is not None else dtk

    # Clamp tiles to the (hardware-aligned) problem size: sublane granularity 8
    # on M, lane granularity 128 on N and K.
    tm = min(tm, _round_up(n, 8))
    tn = min(tn, _round_up(d_out, 128))
    tk = min(tk, _round_up(d_in, 128))

    m_p = _round_up(n, tm)
    k_p = _round_up(d_in, tk)
    n_p = _round_up(d_out, tn)

    # bf16 MXU inputs; zero-padding contributes nothing to the accumulation.
    x_p = jnp.pad(x.astype(jnp.bfloat16), ((0, m_p - n), (0, k_p - d_in)))
    w_p = jnp.pad(w.astype(jnp.bfloat16), ((0, k_p - d_in), (0, n_p - d_out)))
    b_p = jnp.pad(
        b.astype(jnp.float32).reshape(1, d_out), ((0, 0), (0, n_p - d_out))
    )

    grid = (m_p // tm, n_p // tn, k_p // tk)

    flops = 2 * n * d_in * d_out
    bytes_accessed = (
        x_p.size * x_p.dtype.itemsize
        + w_p.size * w_p.dtype.itemsize
        + b_p.size * b_p.dtype.itemsize
        + m_p * n_p * 4
    )

    out_p = pl.pallas_call(
        _linear_kernel,
        out_shape=jax.ShapeDtypeStruct((m_p, n_p), jnp.float32),
        grid=grid,
        in_specs=[
            pl.BlockSpec((tm, tk), lambda i, j, k: (i, k)),   # activations
            pl.BlockSpec((tk, tn), lambda i, j, k: (k, j)),   # weights
            pl.BlockSpec((1, tn), lambda i, j, k: (0, j)),    # bias (const in i,k)
        ],
        out_specs=pl.BlockSpec((tm, tn), lambda i, j, k: (i, j)),
        scratch_shapes=[pltpu.VMEM((tm, tn), jnp.float32)],
        compiler_params=pltpu.CompilerParams(
            dimension_semantics=("parallel", "parallel", "arbitrary"),
        ),
        cost_estimate=pl.CostEstimate(
            flops=flops, transcendentals=0, bytes_accessed=bytes_accessed
        ),
    )(x_p, w_p, b_p)

    return out_p[:n, :d_out]


class BaseModelJAX:
    """Mirror of BaseModel: holds a backbone (its params) and delegates forward."""

    def __init__(self, backbone_params):
        self.backbone = backbone_params  # (w, b)

    def forward(self, x):
        w, b = self.backbone
        return base_model_forward(x, w, b)


def _reference(x, w, b):
    # Same bf16-input / f32-accumulation contract as the kernel.
    return (
        jnp.dot(
            x.astype(jnp.bfloat16),
            w.astype(jnp.bfloat16),
            preferred_element_type=jnp.float32,
        )
        + b.astype(jnp.float32).reshape(1, -1)
    )


if __name__ == "__main__":
    key = jax.random.PRNGKey(0)
    kx, kw, kb = jax.random.split(key, 3)

    # Lane-dense, tile-aligned shapes that exercise a real (2, 2, 4) grid with
    # explicit 128-tiles (multi-step K accumulation + parallel M/N).
    n, d_in, d_out = 256, 512, 256
    x = jax.random.normal(kx, (n, d_in), dtype=jnp.float32)
    w = jax.random.normal(kw, (d_in, d_out), dtype=jnp.float32) * 0.1
    b = jax.random.normal(kb, (1, d_out), dtype=jnp.float32) * 0.1

    out = base_model_forward(x, w, b, tm=128, tn=128, tk=128)
    out = jax.block_until_ready(out)
    ref = _reference(x, w, b)
    assert out.shape == (n, d_out)
    assert jnp.allclose(out, ref, atol=1e-3, rtol=1e-3), (
        float(jnp.max(jnp.abs(out - ref)))
    )

    # Also cover the original tiny / unaligned case (8x32 -> 32) through the
    # padding path and the auto-selected per-generation tiles.
    n2, d2_in, d2_out = 8, 32, 32
    x2 = jax.random.normal(kx, (n2, d2_in), dtype=jnp.float32)
    w2 = jax.random.normal(kw, (d2_in, d2_out), dtype=jnp.float32) * 0.1
    b2 = jax.random.normal(kb, (1, d2_out), dtype=jnp.float32) * 0.1

    model = BaseModelJAX((w2, b2))
    out2 = jax.block_until_ready(model.forward(x2))
    ref2 = _reference(x2, w2, b2)
    assert out2.shape == (n2, d2_out)
    assert jnp.allclose(out2, ref2, atol=1e-3, rtol=1e-3)

    print("KERNEL_OK")
</pallas_src>

<mosaic_0001>
module attributes {stable_mosaic.version = 11 : i64} {
  func.func @_linear_kernel(%arg0: i32, %arg1: i32, %arg2: i32, %arg3: memref<128x128xbf16, #tpu.memory_space<vmem>>, %arg4: memref<128x128xbf16, #tpu.memory_space<vmem>>, %arg5: memref<1x128xf32, #tpu.memory_space<vmem>>, %arg6: memref<128x128xf32, #tpu.memory_space<vmem>>, %arg7: memref<128x128xf32, #tpu.memory_space<vmem>>) attributes {dimension_semantics = [#tpu.dimension_semantics<parallel>, #tpu.dimension_semantics<parallel>, #tpu.dimension_semantics<arbitrary>], iteration_bounds = array<i64: 2, 2, 4>, scalar_prefetch = 0 : i64, scratch_operands = 1 : i64, tpu.core_type = #tpu.core_type<tc>, window_params = [{transform_indices = @transform_0, window_bounds = array<i64: 128, 128>}, {transform_indices = @transform_1, window_bounds = array<i64: 128, 128>}, {transform_indices = @transform_2, window_bounds = array<i64: 1, 128>}, {transform_indices = @transform_3, window_bounds = array<i64: 128, 128>}]} {
    %c0_i32 = arith.constant 0 : i32
    %0 = arith.cmpi eq, %arg2, %c0_i32 : i32
    %1 = arith.extui %0 : i1 to i32
    %c0_i32_0 = arith.constant 0 : i32
    %2 = arith.cmpi ne, %1, %c0_i32_0 : i32
    scf.if %2 {
      %cst_9 = arith.constant 0.000000e+00 : f32
      %12 = vector.broadcast %cst_9 : f32 to vector<128x128xf32>
      %c0_10 = arith.constant 0 : index
      %c0_11 = arith.constant 0 : index
      %13 = vector.load %arg7[%c0_10, %c0_11] : memref<128x128xf32, #tpu.memory_space<vmem>>, vector<128x128xf32>
      tpu.vector_store %arg7[%c0_10, %c0_11], %12 {strides = array<i32>} : memref<128x128xf32, #tpu.memory_space<vmem>>, vector<128x128xf32>,
    } else {
    }
    %c0 = arith.constant 0 : index
    %c0_1 = arith.constant 0 : index
    %3 = vector.load %arg7[%c0, %c0_1] : memref<128x128xf32, #tpu.memory_space<vmem>>, vector<128x128xf32>
    %c0_2 = arith.constant 0 : index
    %c0_3 = arith.constant 0 : index
    %4 = vector.load %arg3[%c0_2, %c0_3] : memref<128x128xbf16, #tpu.memory_space<vmem>>, vector<128x128xbf16>
    %c0_4 = arith.constant 0 : index
    %c0_5 = arith.constant 0 : index
    %5 = vector.load %arg4[%c0_4, %c0_5] : memref<128x128xbf16, #tpu.memory_space<vmem>>, vector<128x128xbf16>
    %cst = arith.constant dense<0.000000e+00> : vector<128x128xf32>
    %6 = tpu.matmul %4, %5, %cst {dimension_numbers = #tpu.dot_dimension_numbers<[1], [0], [0], [1], [0, 0, 1, 1], [], []>} : vector<128x128xbf16>, vector<128x128xbf16>, vector<128x128xf32> -> vector<128x128xf32>
    %7 = arith.addf %3, %6 : vector<128x128xf32>
    %c0_6 = arith.constant 0 : index
    %c0_7 = arith.constant 0 : index
    %8 = vector.load %arg7[%c0_6, %c0_7] : memref<128x128xf32, #tpu.memory_space<vmem>>, vector<128x128xf32>
    tpu.vector_store %arg7[%c0_6, %c0_7], %7 {strides = array<i32>} : memref<128x128xf32, #tpu.memory_space<vmem>>, vector<128x128xf32>,
    %c3_i32 = arith.constant 3 : i32
    %9 = arith.cmpi eq, %arg2, %c3_i32 : i32
    %10 = arith.extui %9 : i1 to i32
    %c0_i32_8 = arith.constant 0 : i32
    %11 = arith.cmpi ne, %10, %c0_i32_8 : i32
    scf.if %11 {
      %c0_9 = arith.constant 0 : index
      %c0_10 = arith.constant 0 : index
      %12 = vector.load %arg7[%c0_9, %c0_10] : memref<128x128xf32, #tpu.memory_space<vmem>>, vector<128x128xf32>
      %c0_11 = arith.constant 0 : index
      %c0_12 = arith.constant 0 : index
      %13 = vector.load %arg5[%c0_11, %c0_12] : memref<1x128xf32, #tpu.memory_space<vmem>>, vector<1x128xf32>
      %14 = vector.broadcast %13 : vector<1x128xf32> to vector<128x128xf32>
      %15 = arith.addf %12, %14 : vector<128x128xf32>
      %c0_13 = arith.constant 0 : index
      %c0_14 = arith.constant 0 : index
      %16 = vector.load %arg6[%c0_13, %c0_14] : memref<128x128xf32, #tpu.memory_space<vmem>>, vector<128x128xf32>
      tpu.vector_store %arg6[%c0_13, %c0_14], %15 {strides = array<i32>} : memref<128x128xf32, #tpu.memory_space<vmem>>, vector<128x128xf32>,
    } else {
    }
    return
  }
  func.func @transform_0(%arg0: i32, %arg1: i32, %arg2: i32) -> (i32, i32) {
    %c0_i32 = arith.constant 0 : i32
    return %arg0, %arg2 : i32, i32
  }
  func.func @transform_1(%arg0: i32, %arg1: i32, %arg2: i32) -> (i32, i32) {
    %c0_i32 = arith.constant 0 : i32
    return %arg2, %arg1 : i32, i32
  }
  func.func @transform_2(%arg0: i32, %arg1: i32, %arg2: i32) -> (i32, i32) {
    %c0_i32 = arith.constant 0 : i32
    %c0_i32_0 = arith.constant 0 : i32
    return %c0_i32, %arg1 : i32, i32
  }
  func.func @transform_3(%arg0: i32, %arg1: i32, %arg2: i32) -> (i32, i32) {
    %c0_i32 = arith.constant 0 : i32
    return %arg0, %arg1 : i32, i32
  }
}

</mosaic_0001>

<bundles_post_ra>
// kernel: tpu_custom_call.1
= control target key start
LH: loop header
LB: loop body
LE: loop exit
PB: predicated region body
PF: predicated region fallthrough
CT: control target
= control target key end

     0   :  { %s1691_s0 = inlined_call_operand.hbm [shape: bf16[256,512], index: 0, kind: input, shape index: {}]   ;;  %s1692_s1 = inlined_call_operand.hbm [shape: bf16[512,256], index: 1, kind: input, shape index: {}]   ;;  %s1693_s2 = inlined_call_operand.vmem [shape: f32[1,256], index: 2, kind: input, shape index: {}]   ;;  %s1694_s3 = inlined_call_operand.hbm [shape: f32[256,256], index: 3, kind: output, shape index: {}]  }
   0x1   :  { %1709 = sst [smem:[#allocation22_spill]] %s1691_s0 }
   0x2   :  { %1710 = sst [smem:[#allocation23_spill]] %s1692_s1 }
   0x3   :  { %1711 = sst [smem:[#allocation24_spill]] %s1693_s2 }
   0x4   :  { %1712 = sst [smem:[#allocation25_spill]] %s1694_s3 }
   0x5   :  { %8 = vsyncpa [#allocation4], 0 }
   0x6   :  { %10 = vsyncpa [#allocation4 + $0x1], 0 }
   0x7   :  { %11 = vsyncpa [#allocation7], 0 }
   0x8   :  { %13 = vsyncpa [#allocation7 + $0x1], 0 }
   0x9   :  { %14 = vsyncpa [#allocation5], 0 }
   0xa   :  { %16 = vsyncpa [#allocation5 + $0x1], 0  ;;  %s1304_s12 = smov 0   ;;  %s1306_s13 = smov 0  }
   0xb   :  { %s1308_s14 = smov 0   ;;  %s1310_s15 = smov 0  }
   0xc   :  { %s1312_s16 = smov 0   ;;  %s1314_s17 = smov 0  }
   0xd   :  { %s1316_s18 = smov 0   ;;  %s1318_s19 = smov 0  }
   0xe   :  { %s1320_s20 = smov 0   ;;  %s1322_s21 = smov 0  }
   0xf   :  { %s1324_s22 = smov 0   ;;  %s1326_s23 = smov 0  }
  0x10   :  { %s1328_s24 = smov 0   ;;  %s1330_s25 = smov 0  }
  0x11   :  { %s1332_s26 = smov 0   ;;  %s1334_s27 = smov 0  }
  0x12 LB: > { %1713 = sst [smem:[#allocation12_spill]] %s1239_s19  ;;  %s772_s28 = sadd.s32 4294967295, %s1271_s27   ;;  %s1271_s27 = sphi %s1334_s27, %s22_s27   ;;  %s1267_s26 = sphi %s1332_s26, %s1762_s26   ;;  %s1263_s25 = sphi %s1330_s25, %s1761_s25   ;;  %s1259_s24 = sphi %s1328_s24, %s1772_s24   ;;  %s1255_s23 = sphi %s1326_s23, %s1759_s23   ;;  %s1251_s22 = sphi %s1324_s22, %s1758_s22   ;;  %s1247_s21 = sphi %s1322_s21, %s1771_s21   ;;  %s1243_s20 = sphi %s1320_s20, %s1770_s20   ;;  %s1239_s19 = sphi %s1318_s19, %s1769_s19   ;;  %s1235_s18 = sphi %s1316_s18, %s1756_s18   ;;  %s1231_s17 = sphi %s1314_s17, %s1768_s17   ;;  %s1227_s16 = sphi %s1312_s16, %s1767_s16   ;;  %s1223_s15 = sphi %s1310_s15, %s1766_s15   ;;  %s1219_s14 = sphi %s1308_s14, %s1765_s14   ;;  %s1215_s13 = sphi %s1306_s13, %s1764_s13   ;;  %s1211_s12 = sphi %s1304_s12, %s1763_s12  }
  0x13   : > { %1714 = sst [smem:[#allocation13_spill]] %s1247_s21  ;;  %s34_s29 = sadd.s32 1, %s1259_s24 }
  0x14   : > { %1715 = sst [smem:[#allocation14_spill]] %s1251_s22  ;;  %p1384_p0 = scmp.ge.s32.totalorder %s34_s29, 4 }
  0x15   : > { %1716 = sst [smem:[#allocation15_spill]] %s1255_s23  ;;  %p57_p1 = scmp.ne.s32.totalorder %s1243_s20, %s1239_s19 }
  0x16   : > { %1717 = sst [smem:[#allocation16_spill]] %s1263_s25  ;;  %s1774_s29 = smov (%p1384_p0, %s34_s29), 0 }
  0x17   : > { %1718 = sst [smem:[#allocation17_spill]] %s1267_s26  ;;  %p1701_p2 = scmp.eq.s32.totalorder %s1271_s27, 0 }
  0x18   : > { %1720 = sst [smem:[#allocation18_spill]] %s1774_s29  ;;  %p63_p3 = scmp.ne.s32.totalorder %s1239_s19, %s1235_s18 }
  0x19   : > { %s1400_s6 = ssub.s32 %s1259_s24, %s1774_s29  ;;  %p1402_p4 = scmp.eq.s32.totalorder %s772_s28, 0 }
  0x1a   : > { %p1408_p5 = por %p1701_p2, %p57_p1  ;;  %p1412_p6 = scmp.eq.s32.totalorder %s772_s28, 15 }
  0x1b   : > { %p1418_p7 = por %p1402_p4, %p63_p3  ;;  %p897_p8 = scmp.lt.s32.totalorder %s1271_s27, 16 }
  0x1c   : > { %s169_s11 = sand.u32 1, %s1243_s20   ;;  %s813_s5 = sshll.u32 %s1267_s26, 6 }
  0x1d   : > { %s1724_s10 = scalar_select %p1418_p7, 1, 0 }
  0x1e   : > { %s776_s18 = sshll.u32 %s169_s11, 6  ;;  %s179_s4 = sadd.s32 %s1259_s24, %s813_s5 }
  0x1f   : > { %1725 = sst [smem:[#allocation19_spill]] %s1724_s10  ;;  %s173_s29 = scalar_lea.vmem [#allocation3], %s776_s18 }
  0x20   : > { %s182_s3 = sshll.u32 %s173_s29, 4  ;;  %s779_s23 = sshll.u32 %s179_s4, 6  ;;  %s183_s3 = int_to_ptr.vmem [resolvable:$true] %s182_s3 }
  0x21   : > { %s1726_s0 = sld [smem:[#allocation22_spill]]  ;;  %p1433_p9 = pnand %p897_p8, %p1408_p5 }
  0x22   : > { %s170_s10 = scalar_lea.sflag [#allocation4], %s169_s11  ;;  %s1064_s19 = scalar_lea.vmem %s183_s3, 1024 }
  0x23   : > { %p1053_p10 = pneg %p1433_p9  ;;  %p1065_p11 = scmp.ne.s32.totalorder %s183_s3, %s1064_s19 }
  0x24   : > { %s1273_s29 = smov [#allocation3]  }
  0x25   : > { %p1067_p12 = pnand %p1065_p11, %p1053_p10  ;;  %s1069_s4 = sshll.u32 %s1273_s29, 4  ;;  %s1070_s4 = int_to_ptr.vmem [resolvable:$false] %s1069_s4 }
  0x26   : > { %s1071_s5 = scalar_lea.vmem %s1070_s4, 2048  ;;  %p1072_p1 = scmp.lt.s32.totalorder %s183_s3, %s1070_s4 }
  0x27   : > { %s181_s28 = scalar_lea.hbm %s1726_s0, %s779_s23  ;;  %p1068_p13 = pneg %p1067_p12 }
  0x28   : > { %p1073_p3 = scmp.lt.s32.totalorder %s1071_s5, %s1064_s19 }
  0x2a   : > { %p1074_p2 = por %p1073_p3, %p1072_p1 }
  0x2c   : > { %p1075_p7 = pnand %p1074_p2, %p1068_p13 }
  0x2e   : > { %1078 = shalt.err (!%p1075_p7)
}
  0x2f   : > { %s1274_s2 = smov 256   ;;  %s1703_s19 = smov 64  }
  0x30   : > { %s1704_s21 = smov 4   ;;  %p784_p2 = scmp.ge.s32.totalorder %s1271_s27, 1 }
  0x31   : > { %889 = dma.hbm_to_vmem [thread:$0]  (!%p1433_p9), %s181_s28, 1024, %s183_s3, %s170_s10, %s1274_s2, %s1703_s19, %s1704_s21  }
  0x32   : > { %p219_p5 = scmp.lt.s32.totalorder %s1271_s27, 17  ;;  %s773_s8 = sadd.s32 4294967294, %s1271_s27  }
  0x33   : > { %s37_s11 = sadd.s32 1, %s1263_s25  ;;  %s78_s18 = sadd.s32 1, %s1231_s17 }
  0x34   : > { %p1445_p7 = pnand %p784_p2, %p219_p5  ;;  %s1776_s11 = smov (!%p1384_p0, %s37_s11), %s1263_s25 }
  0x35   : > { %p85_p10 = scmp.ne.s32.totalorder %s1231_s17, %s1227_s16  ;;  %p91_p9 = scmp.ne.s32.totalorder %s1227_s16, %s1223_s15 }
  0x36   : > { %p39_p11 = scmp.ge.s32.totalorder %s1776_s11, 2  ;;  %s132_s3 = sadd.s32 1, %s1219_s14 }
  0x37   : > { %p1729_p12 = scmp.eq.s32.totalorder %s1271_s27, 0  ;;  %p1468_p1 = por %p91_p9, %p1402_p4 }
  0x38   : > { %s1778_s11 = smov (%p39_p11, %s1776_s11), 0  ;;  %s1733_s30 = sadd.s32 1, %s1267_s26 }
  0x39   : > { %p1462_p13 = por %p85_p10, %p1729_p12  ;;  %1732 = sst [smem:[#allocation20_spill]] %s1778_s11 }
  0x3a   : > { %s1780_s30 = smov (!%p39_p11, %s1733_s30), %s1267_s26  ;;  %s74_s15 = ssub.s32 %s1263_s25, %s1778_s11 }
  0x3b   : > { %p142_p0 = scmp.ne.s32.totalorder %s1219_s14, %s1215_s13  ;;  %p43_p3 = scmp.ge.s32.totalorder %s1780_s30, 2 }
  0x3c   : > { %s75_s28 = sor.u32 %s74_s15, %s1400_s6  ;;  %p148_p5 = scmp.ne.s32.totalorder %s1215_s13, %s1211_s12 }
  0x3d   : > { %p76_p2 = scmp.eq.s32.totalorder %s75_s28, 0  ;;  %p1484_p4 = por %p1412_p6, %p142_p0 }
  0x3e   : > { %s1782_s30 = smov (%p43_p3, %s1780_s30), 0  ;;  %p149_p11 = scmp.eq.s32.totalorder %s773_s8, 15 }
  0x3f   : > { %1735 = sst [smem:[#allocation21_spill]] %s1782_s30  ;;  %s45_s4 = ssub.s32 %s1267_s26, %s1782_s30 }
  0x40   : > { %s1491_s29 = scalar_select %p76_p2, %s1231_s17, %s78_s18  }
  0x41   : > { %s47_s5 = sor.u32 %s1400_s6, %s45_s4  ;;  %s129_s2 = sor.u32 %s74_s15, %s45_s4 }
  0x42   : > { %p48_p10 = scmp.eq.s32.totalorder %s47_s5, 0  ;;  %p130_p9 = scmp.eq.s32.totalorder %s129_s2, 0 }
  0x43   : > { %s192_s9 = sand.u32 1, %s1231_s17   ;;  %s1736_s28 = sadd.s32 1, %s1243_s20 }
  0x44   : > { %s1502_s19 = scalar_select %p48_p10, %s1243_s20, %s1736_s28  }
  0x45   : > { %s1505_s21 = scalar_select %p130_p9, %s1219_s14, %s132_s3  }
  0x46   : > { %p1507_p6 = por %p149_p11, %p148_p5  ;;  %s780_s18 = sshll.u32 %s192_s9, 6 }
  0x47   : > { %s814_s30 = sshll.u32 %s1259_s24, 5  ;;  %s196_s15 = scalar_lea.vmem [#allocation6], %s780_s18 }
  0x48   : > { %s1737_s0 = scalar_select %p1507_p6, 1, 0 }
  0x49   : > { %s202_s11 = sadd.s32 %s1263_s25, %s814_s30  ;;  %s205_s4 = sshll.u32 %s196_s15, 4  ;;  %s206_s4 = int_to_ptr.vmem [resolvable:$true] %s205_s4 }
  0x4a   : > { %s783_s6 = sshll.u32 %s202_s11, 6  ;;  %s1738_s1 = sld [smem:[#allocation23_spill]] }
  0x4b   : > { %p1520_p12 = pnand %p897_p8, %p1462_p13  ;;  %s193_s2 = scalar_lea.sflag [#allocation7], %s192_s9 }
  0x4c   : > { %s1092_s28 = scalar_lea.vmem %s206_s4, 1024  ;;  %s1277_s11 = smov [#allocation6]  }
  0x4d   : > { %p1081_p0 = pneg %p1520_p12  ;;  %p1093_p3 = scmp.ne.s32.totalorder %s206_s4, %s1092_s28 }
  0x4e   : > { %s1097_s30 = sshll.u32 %s1277_s11, 4  ;;  %s1098_s30 = int_to_ptr.vmem [resolvable:$false] %s1097_s30 }
  0x4f   : > { %p1095_p2 = pnand %p1093_p3, %p1081_p0  ;;  %s1099_s26 = scalar_lea.vmem %s1098_s30, 2048 }
  0x50   : > { %s204_s8 = scalar_lea.hbm %s1738_s1, %s783_s6  ;;  %p1100_p10 = scmp.lt.s32.totalorder %s206_s4, %s1098_s30 }
  0x51   : > { %p1096_p5 = pneg %p1095_p2  ;;  %p1101_p9 = scmp.lt.s32.totalorder %s1099_s26, %s1092_s28 }
  0x53   : > { %p1102_p11 = por %p1101_p9, %p1100_p10 }
  0x55   : > { %p1103_p6 = pnand %p1102_p11, %p1096_p5 }
  0x57   : > { %1106 = shalt.err (!%p1103_p6)
}
  0x58   : > { %s1278_s22 = smov 128   ;;  %s1740_s18 = smov 4  }
  0x59   : > { %s1741_s9 = smov 64   ;;  %223 = sbr.rel (%p1445_p7) target bundleno = 413 (0x19d), region = 32 }
  0x5a   : > { %892 = dma.hbm_to_vmem [thread:$0]  (!%p1520_p12), %s204_s8, 1024, %s206_s4, %s193_s2, %s1278_s22, %s1741_s9, %s1740_s18  }
  0x5b   : > { %s1742_s6 = sld [smem:[#allocation12_spill]] (!%p1445_p7) }
  0x5c   : > { %s1743_s15 = sld [smem:[#allocation19_spill]] (!%p1445_p7) }
  0x61   : > { %s225_s5 = sand.u32 1, %s1742_s6  }
  0x62   : > { %s785_s11 = sshll.u32 %s225_s5, 6  ;;  %s226_s1 = scalar_lea.sflag [#allocation4], %s225_s5 }
  0x63   : > { %s1533_s25 = scalar_lea.vmem [#allocation3], %s785_s11  ;;  %p1744_p8 = scmp.ne.s32.totalorder %s1743_s15, 0 }
  0x65   : > { %1198 = dma.done.wait (%p1744_p8), %s226_s1, 1024  }
  0x66   : > { %1200 = vsyncadd (%p1744_p8), %s226_s1, 4294966272  ;;  %s234_s3 = sand.u32 1, %s1227_s16  }
  0x67   : > { %s786_s28 = sshll.u32 %s234_s3, 6  ;;  %s235_s4 = scalar_lea.sflag [#allocation7], %s234_s3 }
  0x68   : > { %s1540_s8 = scalar_lea.vmem [#allocation6], %s786_s28 }
  0x69   : > { %1202 = dma.done.wait (%p1468_p1), %s235_s4, 1024  }
  0x6a   : > { %1204 = vsyncadd (%p1468_p1), %s235_s4, 4294966272  ;;  %s1745_s23 = sld [smem:[#allocation14_spill]]  ;;  %s266_s2 = sand.u32 1, %s1215_s13  }
  0x6b   : > { %s787_s1 = sshll.u32 %s266_s2, 7  ;;  %s1746_s22 = sld [smem:[#allocation24_spill]] }
  0x6c   : > { %s1557_s9 = scalar_lea.vmem [#allocation8], %s787_s1  ;;  %s1747_s6 = sld [smem:[#allocation13_spill]] }
  0x70   : > { %p271_p7 = scmp.lt.s32.totalorder %s1745_s23, 1 }
  0x72   : > { %s1784_s23 = smov (!%p271_p7, %s1745_s23), 1  ;;  %p788_p13 = scmp.ne.s32.totalorder %s1747_s6, 0 }
  0x73   : > { %s273_s18 = scalar_lea.vmem %s1746_s22, %s1784_s23 }
  0x74   : > { %279 = sbr.rel (%p788_p13) target bundleno = 130 (0x82), region = 44 }
  0x79   : > { %v1279_v0 = vmov 0.0  }
  0x7a   : > { %280 = vst [vmem:[#allocation2 + $0x30] sm:$0xff] %v1279_v0  ;;  %281 = vst [vmem:[#allocation2] sm:$0xff] %v1279_v0 }
  0x7b   : > { %282 = vst [vmem:[#allocation2 + $0x58] sm:$0xff] %v1279_v0  ;;  %283 = vst [vmem:[#allocation2 + $0x18] sm:$0xff] %v1279_v0 }
  0x7c   : > { %284 = vst [vmem:[#allocation2 + $0x50] sm:$0xff] %v1279_v0  ;;  %285 = vst [vmem:[#allocation2 + $0x68] sm:$0xff] %v1279_v0 }
  0x7d   : > { %286 = vst [vmem:[#allocation2 + $0x8] sm:$0xff] %v1279_v0  ;;  %287 = vst [vmem:[#allocation2 + $0x48] sm:$0xff] %v1279_v0 }
  0x7e   : > { %288 = vst [vmem:[#allocation2 + $0x40] sm:$0xff] %v1279_v0  ;;  %289 = vst [vmem:[#allocation2 + $0x20] sm:$0xff] %v1279_v0 }
  0x7f   : > { %290 = vst [vmem:[#allocation2 + $0x10] sm:$0xff] %v1279_v0  ;;  %291 = vst [vmem:[#allocation2 + $0x38] sm:$0xff] %v1279_v0 }
  0x80   : > { %292 = vst [vmem:[#allocation2 + $0x60] sm:$0xff] %v1279_v0  ;;  %293 = vst [vmem:[#allocation2 + $0x70] sm:$0xff] %v1279_v0 }
  0x81   : > { %294 = vst [vmem:[#allocation2 + $0x78] sm:$0xff] %v1279_v0  ;;  %295 = vst [vmem:[#allocation2 + $0x28] sm:$0xff] %v1279_v0 }
  0x82 PF: > { %v1035_v1 = vld [vmem:[%s1540_s8 + $0x38] sm:$0xff]   ;;  %v1036_v2 = vld [vmem:[%s1540_s8 + $0x30] sm:$0xff]   ;;  %v1037_v3 = vld [vmem:[%s1540_s8 + $0x28] sm:$0xff]  }
  0x83   : > { %832 = vmatprep.subr.bf16.mxu0 %v1035_v1  ;;  %864 = vmatprep.subr.bf16.mxu1 %v1035_v1  ;;  %v1038_v4 = vld [vmem:[%s1540_s8 + $0x20] sm:$0xff]   ;;  %v1039_v7 = vld [vmem:[%s1540_s8 + $0x18] sm:$0xff]   ;;  %v1040_v8 = vld [vmem:[%s1540_s8 + $0x10] sm:$0xff]  }
  0x84   : > { %833 = vmatpush3.bf16.msra.mxu0 %v1035_v1  ;;  %872 = vmatpush3.bf16.msra.mxu1 %v1035_v1  ;;  %v1043_v5 = vld [vmem:[%s1533_s25] sm:$0xff]   ;;  %v1041_v9 = vld [vmem:[%s1540_s8 + $0x8] sm:$0xff]   ;;  %v1047_v13 = vld [vmem:[%s1533_s25 + $0x10] sm:$0xff]  }
  0x85   : > { %834 = vmatprep.subr.bf16.mxu0 %v1036_v2  ;;  %865 = vmatprep.subr.bf16.mxu1 %v1036_v2  ;;  %v1044_v6 = vld [vmem:[%s1533_s25 + $0x20] sm:$0xff]   ;;  %v1045_v11 = vld [vmem:[%s1533_s25 + $0x8] sm:$0xff]   ;;  %v1048_v14 = vld [vmem:[%s1533_s25 + $0x30] sm:$0xff]  }
  0x86   : > { %848 = vmatprep.mubr.bf16.mxu0 %v1043_v5  ;;  %856 = vmatprep.mubr.bf16.mxu1 %v1044_v6  ;;  %v1042_v10 = vld [vmem:[%s1540_s8] sm:$0xff]   ;;  %v1046_v12 = vld [vmem:[%s1533_s25 + $0x28] sm:$0xff]   ;;  %v1049_v15 = vld [vmem:[%s1533_s25 + $0x18] sm:$0xff]  }
  0x87   : > { %v1050_v16 = vld [vmem:[%s1533_s25 + $0x38] sm:$0xff]   ;;  %v306_v18 = vld [vmem:[#allocation2 + $0x10] sm:$0xff]  ;;  %v304_v22 = vld [vmem:[#allocation2 + $0x40] sm:$0xff]  ;;  %s1748_s25 = sld [smem:[#allocation13_spill]] }
  0x88   : > { %835 = vmatpush3.bf16.msra.mxu0 %v1036_v2  ;;  %873 = vmatpush3.bf16.msra.mxu1 %v1036_v2  ;;  %v298_v17 = vld [vmem:[#allocation2 + $0x58] sm:$0xff]  ;;  %v296_v21 = vld [vmem:[#allocation2 + $0x30] sm:$0xff]  ;;  %v297_v33 = vld [vmem:[#allocation2] sm:$0xff] }
  0x89   : > { %836 = vmatprep.subr.bf16.mxu0 %v1037_v3  ;;  %866 = vmatprep.subr.bf16.mxu1 %v1037_v3  ;;  %v299_v27 = vld [vmem:[#allocation2 + $0x18] sm:$0xff]  ;;  %v305_v34 = vld [vmem:[#allocation2 + $0x20] sm:$0xff]  ;;  %v302_v39 = vld [vmem:[#allocation2 + $0x8] sm:$0xff] }
  0x8a   : > { %v307_v28 = vld [vmem:[#allocation2 + $0x38] sm:$0xff]  ;;  %v300_v45 = vld [vmem:[#allocation2 + $0x50] sm:$0xff]  ;;  %v308_v46 = vld [vmem:[#allocation2 + $0x60] sm:$0xff] }
  0x8b   : > { %v310_v40 = vld [vmem:[#allocation2 + $0x78] sm:$0xff]  ;;  %v303_v51 = vld [vmem:[#allocation2 + $0x48] sm:$0xff]  ;;  %v309_v58 = vld [vmem:[#allocation2 + $0x70] sm:$0xff] }
  0x8c   : > { %837 = vmatpush3.bf16.msra.mxu0 %v1037_v3  ;;  %874 = vmatpush3.bf16.msra.mxu1 %v1037_v3  ;;  %v311_v52 = vld [vmem:[#allocation2 + $0x28] sm:$0xff] }
  0x8d   : > { %838 = vmatprep.subr.bf16.mxu0 %v1038_v4  ;;  %867 = vmatprep.subr.bf16.mxu1 %v1038_v4  ;;  %v301_v57 = vld [vmem:[#allocation2 + $0x68] sm:$0xff]  ;;  %p805_p1 = scmp.ne.s32.totalorder %s1748_s25, 3 }
  0x90   : > { %839 = vmatpush3.bf16.msra.mxu0 %v1038_v4  ;;  %875 = vmatpush3.bf16.msra.mxu1 %v1038_v4 }
  0x91   : > { %840 = vmatprep.subr.bf16.mxu0 %v1039_v7  ;;  %868 = vmatprep.subr.bf16.mxu1 %v1039_v7 }
  0x94   : > { %841 = vmatpush3.bf16.msra.mxu0 %v1039_v7  ;;  %876 = vmatpush3.bf16.msra.mxu1 %v1039_v7 }
  0x95   : > { %842 = vmatprep.subr.bf16.mxu0 %v1040_v8  ;;  %869 = vmatprep.subr.bf16.mxu1 %v1040_v8 }
  0x98   : > { %843 = vmatpush3.bf16.msra.mxu0 %v1040_v8  ;;  %877 = vmatpush3.bf16.msra.mxu1 %v1040_v8 }
  0x99   : > { %844 = vmatprep.subr.bf16.mxu0 %v1041_v9  ;;  %870 = vmatprep.subr.bf16.mxu1 %v1041_v9 }
  0x9c   : > { %845 = vmatpush3.bf16.msra.mxu0 %v1041_v9  ;;  %878 = vmatpush3.bf16.msra.mxu1 %v1041_v9 }
  0x9d   : > { %846 = vmatprep.subr.bf16.mxu0 %v1042_v10  ;;  %871 = vmatprep.subr.bf16.mxu1 %v1042_v10 }
  0xa0   : > { %847 = vmatpush3.bf16.msra.mxu0 %v1042_v10  ;;  %879 = vmatpush3.bf16.msra.mxu1 %v1042_v10 }
  0xa3   : > { %849 = vmatmul.mubr.bf16.vlgmr.msra.gmra.mxu0 %v1045_v11  ;;  %857 = vmatmul.mubr.bf16.vlgmr.msra.gmra.mxu1 %v1046_v12 }
  0xa4   : > { %852 = vmatprep.mubr.bf16.mxu0 %v1047_v13  ;;  %860 = vmatprep.mubr.bf16.mxu1 %v1048_v14 }
  0xab   : > { %853 = vmatmul.mubr.bf16.gmra.mxu0 %v1049_v15  ;;  %861 = vmatmul.mubr.bf16.gmra.mxu1 %v1050_v16 }
 0x163   : > { %v850_v19 = vpop.f32.mrf.mxu0  ;;  %v858_v20 = vpop.f32.mrf.mxu1 }
 0x164   : > { %v539_v23 = vadd.f32 %v850_v19, %v298_v17  ;;  %v547_v24 = vadd.f32 %v858_v20, %v306_v18 }
 0x165   : > { %v474_v25 = vpop.f32.mrf.mxu0  ;;  %v506_v26 = vpop.f32.mrf.mxu1 }
 0x166   : > { %555 = vst [vmem:[#allocation2 + $0x58] sm:$0xff] %v539_v23  ;;  %563 = vst [vmem:[#allocation2 + $0x10] sm:$0xff] %v547_v24  ;;  %v537_v29 = vadd.f32 %v474_v25, %v296_v21  ;;  %v545_v30 = vadd.f32 %v506_v26, %v304_v22 }
 0x167   : > { %v851_v31 = vpop.f32.mrf.mxu0  ;;  %v859_v32 = vpop.f32.mrf.mxu1 }
 0x168   : > { %553 = vst [vmem:[#allocation2 + $0x30] sm:$0xff] %v537_v29  ;;  %561 = vst [vmem:[#allocation2 + $0x40] sm:$0xff] %v545_v30  ;;  %v540_v35 = vadd.f32 %v851_v31, %v299_v27  ;;  %v548_v36 = vadd.f32 %v859_v32, %v307_v28 }
 0x169   : > { %v477_v37 = vpop.f32.mrf.mxu0  ;;  %v509_v38 = vpop.f32.mrf.mxu1 }
 0x16a   : > { %556 = vst [vmem:[#allocation2 + $0x18] sm:$0xff] %v540_v35  ;;  %564 = vst [vmem:[#allocation2 + $0x38] sm:$0xff] %v548_v36  ;;  %v538_v41 = vadd.f32 %v477_v37, %v297_v33  ;;  %v546_v42 = vadd.f32 %v509_v38, %v305_v34 }
 0x16b   : > { %v854_v43 = vpop.f32.mrf.mxu0  ;;  %v862_v44 = vpop.f32.mrf.mxu1 }
 0x16c   : > { %554 = vst [vmem:[#allocation2] sm:$0xff] %v538_v41  ;;  %562 = vst [vmem:[#allocation2 + $0x20] sm:$0xff] %v546_v42  ;;  %v543_v47 = vadd.f32 %v854_v43, %v302_v39  ;;  %v551_v48 = vadd.f32 %v862_v44, %v310_v40 }
 0x16d   : > { %v490_v49 = vpop.f32.mrf.mxu0  ;;  %v522_v50 = vpop.f32.mrf.mxu1 }
 0x16e   : > { %559 = vst [vmem:[#allocation2 + $0x8] sm:$0xff] %v543_v47  ;;  %567 = vst [vmem:[#allocation2 + $0x78] sm:$0xff] %v551_v48  ;;  %v541_v53 = vadd.f32 %v490_v49, %v300_v45  ;;  %v549_v54 = vadd.f32 %v522_v50, %v308_v46 }
 0x16f   : > { %v855_v55 = vpop.f32.mrf.mxu0  ;;  %v863_v56 = vpop.f32.mrf.mxu1 }
 0x170   : > { %557 = vst [vmem:[#allocation2 + $0x50] sm:$0xff] %v541_v53  ;;  %565 = vst [vmem:[#allocation2 + $0x60] sm:$0xff] %v549_v54  ;;  %v544_v59 = vadd.f32 %v855_v55, %v303_v51  ;;  %v552_v60 = vadd.f32 %v863_v56, %v311_v52  ;;  %572 = sbr.rel (%p805_p1) target bundleno = 384 (0x180), region = 48 }
 0x171   : > { %v493_v61 = vpop.f32.mrf.mxu0  ;;  %v525_v62 = vpop.f32.mrf.mxu1 }
 0x172   : > { %560 = vst [vmem:[#allocation2 + $0x48] sm:$0xff] %v544_v59  ;;  %568 = vst [vmem:[#allocation2 + $0x28] sm:$0xff] %v552_v60  ;;  %v542_v63 = vadd.f32 %v493_v61, %v301_v57  ;;  %v550_v0 = vadd.f32 %v525_v62, %v309_v58 }
 0x174   : > { %558 = vst [vmem:[#allocation2 + $0x68] sm:$0xff] %v542_v63  ;;  %566 = vst [vmem:[#allocation2 + $0x70] sm:$0xff] %v550_v0 }
 0x175   : > { %v573_v1 = vld [vmem:[#allocation2 + $0x30] sm:$0xff]  ;;  %v806_v2 = vld [vmem:[%s273_s18] ss:$0 sm:$0xff]  ;;  %v575_v6 = vld [vmem:[#allocation2 + $0x58] sm:$0xff] }
 0x176   : > { %v574_v3 = vld [vmem:[#allocation2] sm:$0xff]  ;;  %v596_v4 = vadd.f32 %v806_v2, %v573_v1  ;;  %v576_v7 = vld [vmem:[#allocation2 + $0x18] sm:$0xff]  ;;  %v598_v9 = vadd.f32 %v806_v2, %v575_v6  ;;  %v579_v13 = vld [vmem:[#allocation2 + $0x8] sm:$0xff] }
 0x177   : > { %v597_v5 = vadd.f32 %v806_v2, %v574_v3  ;;  %v577_v8 = vld [vmem:[#allocation2 + $0x50] sm:$0xff]  ;;  %v599_v10 = vadd.f32 %v806_v2, %v576_v7  ;;  %v602_v16 = vadd.f32 %v806_v2, %v579_v13  ;;  %v581_v18 = vld [vmem:[#allocation2 + $0x40] sm:$0xff]  ;;  %v584_v24 = vld [vmem:[#allocation2 + $0x38] sm:$0xff] }
 0x178   : > { %v600_v11 = vadd.f32 %v806_v2, %v577_v8  ;;  %612 = vst [vmem:[%s1557_s9] sm:$0xff] %v596_v4  ;;  %v582_v19 = vld [vmem:[#allocation2 + $0x20] sm:$0xff]  ;;  %v583_v20 = vld [vmem:[#allocation2 + $0x10] sm:$0xff]  ;;  %614 = vst [vmem:[%s1557_s9 + $0x10] sm:$0xff] %v598_v9  ;;  %v604_v21 = vadd.f32 %v806_v2, %v581_v18  ;;  %v607_v27 = vadd.f32 %v806_v2, %v584_v24 }
 0x179   : > { %v580_v14 = vld [vmem:[#allocation2 + $0x48] sm:$0xff]  ;;  %613 = vst [vmem:[%s1557_s9 + $0x8] sm:$0xff] %v597_v5  ;;  %615 = vst [vmem:[%s1557_s9 + $0x18] sm:$0xff] %v599_v10  ;;  %v605_v22 = vadd.f32 %v806_v2, %v582_v19  ;;  %v606_v23 = vadd.f32 %v806_v2, %v583_v20  ;;  %v585_v25 = vld [vmem:[#allocation2 + $0x60] sm:$0xff] }
 0x17a   : > { %v603_v17 = vadd.f32 %v806_v2, %v580_v14  ;;  %616 = vst [vmem:[%s1557_s9 + $0x20] sm:$0xff] %v600_v11  ;;  %618 = vst [vmem:[%s1557_s9 + $0x30] sm:$0xff] %v602_v16  ;;  %v608_v28 = vadd.f32 %v806_v2, %v585_v25  ;;  %v587_v30 = vld [vmem:[#allocation2 + $0x78] sm:$0xff]  ;;  %v588_v31 = vld [vmem:[#allocation2 + $0x28] sm:$0xff] }
 0x17b   : > { %v578_v12 = vld [vmem:[#allocation2 + $0x68] sm:$0xff]  ;;  %v586_v26 = vld [vmem:[#allocation2 + $0x70] sm:$0xff]  ;;  %620 = vst [vmem:[%s1557_s9 + $0x40] sm:$0xff] %v604_v21  ;;  %621 = vst [vmem:[%s1557_s9 + $0x48] sm:$0xff] %v605_v22  ;;  %v610_v32 = vadd.f32 %v806_v2, %v587_v30  ;;  %v611_v33 = vadd.f32 %v806_v2, %v588_v31 }
 0x17c   : > { %v601_v15 = vadd.f32 %v806_v2, %v578_v12  ;;  %619 = vst [vmem:[%s1557_s9 + $0x38] sm:$0xff] %v603_v17  ;;  %v609_v29 = vadd.f32 %v806_v2, %v586_v26  ;;  %622 = vst [vmem:[%s1557_s9 + $0x50] sm:$0xff] %v606_v23 }
 0x17d   : > { %623 = vst [vmem:[%s1557_s9 + $0x58] sm:$0xff] %v607_v27  ;;  %624 = vst [vmem:[%s1557_s9 + $0x60] sm:$0xff] %v608_v28 }
 0x17e   : > { %617 = vst [vmem:[%s1557_s9 + $0x28] sm:$0xff] %v601_v15  ;;  %625 = vst [vmem:[%s1557_s9 + $0x68] sm:$0xff] %v609_v29 }
 0x17f   : > { %626 = vst [vmem:[%s1557_s9 + $0x70] sm:$0xff] %v610_v32  ;;  %627 = vst [vmem:[%s1557_s9 + $0x78] sm:$0xff] %v611_v33 }
 0x180 PF: > { %s1750_s11 = sld [smem:[#allocation15_spill]]  ;;  %s644_s8 = sshll.u32 %s1557_s9, 4  ;;  %s1601_s8 = int_to_ptr.vmem [resolvable:$true] %s644_s8 }
 0x181   : > { %s1751_s3 = sld [smem:[#allocation14_spill]]  ;;  %s1610_s18 = scalar_lea.sflag [#allocation5], %s266_s2 }
 0x182   : > { %s1752_s26 = sld [smem:[#allocation25_spill]]  ;;  %s1107_s25 = scalar_lea.vmem %s1601_s8, 2048 }
 0x183   : > { %p1108_p6 = scmp.ne.s32.totalorder %s1601_s8, %s1107_s25  ;;  %s1280_s9 = smov [#allocation8]  }
 0x184   : > { %s1111_s10 = sshll.u32 %s1280_s9, 4  ;;  %s1112_s10 = int_to_ptr.vmem [resolvable:$false] %s1111_s10 }
 0x185   : > { %p1109_p12 = pnand %p1108_p6, %p1484_p4  ;;  %s1113_s15 = scalar_lea.vmem %s1112_s10, 4096 }
 0x186   : > { %s815_s28 = sshll.u32 %s1750_s11, 5  ;;  %p1114_p3 = scmp.lt.s32.totalorder %s1601_s8, %s1112_s10 }
 0x187   : > { %s641_s4 = sadd.s32 %s1751_s3, %s815_s28  ;;  %p1110_p0 = pneg %p1109_p12 }
 0x188   : > { %s810_s23 = sshll.u32 %s641_s4, 7  ;;  %s1753_s6 = smov %s1752_s26 }
 0x189   : > { %s1606_s22 = scalar_lea.hbm %s1752_s26, %s810_s23  ;;  %p1115_p2 = scmp.lt.s32.totalorder %s1113_s15, %s1107_s25 }
 0x18b   : > { %p1116_p5 = por %p1115_p2, %p1114_p3 }
 0x18d   : > { %p1117_p10 = pnand %p1116_p5, %p1110_p0 }
 0x18f   : > { %1120 = shalt.err (!%p1117_p10)
}
 0x190   : > { %s1121_s2 = scalar_lea.hbm %s1606_s22, 2048  ;;  %s1125_s3 = scalar_lea.hbm %s1753_s6, 8192 }
 0x191   : > { %p1122_p9 = scmp.ne.s32.totalorder %s1606_s22, %s1121_s2  ;;  %p1126_p7 = scmp.lt.s32.totalorder %s1606_s22, %s1753_s6 }
 0x192   : > { %p1127_p13 = scmp.lt.s32.totalorder %s1125_s3, %s1121_s2 }
 0x193   : > { %p1123_p11 = pnand %p1122_p9, %p1484_p4 }
 0x194   : > { %p1128_p1 = por %p1127_p13, %p1126_p7 }
 0x195   : > { %p1124_p8 = pneg %p1123_p11 }
 0x197   : > { %p1129_p6 = pnand %p1128_p1, %p1124_p8 }
 0x199   : > { %1132 = shalt.err (!%p1129_p6)
}
 0x19a   : > { %s1281_s23 = smov 128   ;;  %s1282_s1 = smov 256  }
 0x19b   : > { %s1283_s30 = smov 8  }
 0x19c   : > { %884 = dma.vmem_to_hbm [thread:$0]  (%p1484_p4), %s1601_s8, 2048, %s1606_s22, %s1610_s18, %s1281_s23, %s1282_s1, %s1283_s30  }
 0x19d PF: > { %p898_p12 = scmp.ge.s32.totalorder %s1271_s27, 2  ;;  %s659_s26 = sand.u32 1, %s1211_s12  }
 0x19e   : > { %p1754_p0 = scmp.ne.s32.totalorder %s1737_s0, 0  ;;  %s660_s25 = scalar_lea.sflag [#allocation5], %s659_s26 }
 0x1a0   : > { %p894_p3 = pnand %p898_p12, %p1754_p0 }
 0x1a2   : > { %p895_p2 = pneg %p894_p3 }
 0x1a4   : > { %1206 = dma.done.wait (%p895_p2), %s660_s25, 2048  }
 0x1a5   : > { %1208 = vsyncadd (%p895_p2), %s660_s25, 4294965248  ;;  %s22_s27 = sadd.s32 1, %s1271_s27   ;;  %s1756_s18 = sld [smem:[#allocation12_spill]] }
 0x1a6   : > { %p1638_p5 = scmp.ge.s32.totalorder %s22_s27, 18   ;;  %s1757_s0 = smov %s1502_s19 }
 0x1a7   : > { %s1758_s22 = sld [smem:[#allocation16_spill]]  ;;  %s1763_s12 = smov %s1215_s13 }
 0x1a8   : > { %s1759_s23 = sld [smem:[#allocation17_spill]]  ;;  %s1764_s13 = smov %s1219_s14 }
 0x1a9   : > { %s1760_s7 = sld [smem:[#allocation18_spill]]  ;;  %s1765_s14 = smov %s1505_s21 }
 0x1aa   : > { %s1761_s25 = sld [smem:[#allocation20_spill]]  ;;  %s1766_s15 = smov %s1227_s16 }
 0x1ab   : > { %s1762_s26 = sld [smem:[#allocation21_spill]]  ;;  %s1767_s16 = smov %s1231_s17 }
 0x1ac   : > { %s1768_s17 = smov %s1491_s29  ;;  %s1769_s19 = smov %s1243_s20 }
 0x1ad   : > { %s1770_s20 = smov %s1757_s0  ;;  %s1771_s21 = smov %s1259_s24 }
 0x1ae   :  { %21 = sbr.rel (!%p1638_p5) target bundleno = 18 (0x12), region = 101 }
 0x1af   : > { %s1772_s24 = smov %s1760_s7 }
 0x1b3   :  { %665 = vsyncpa [#allocation4], 1 }
 0x1b4   :  { %667 = vsyncpa [#allocation4 + $0x1], 1 }
 0x1b5   :  { %668 = vsyncpa [#allocation7], 1 }
 0x1b6   :  { %670 = vsyncpa [#allocation7 + $0x1], 1 }
 0x1b7   :  { %671 = vsyncpa [#allocation5], 1 }
 0x1b8   :  { %673 = vsyncpa [#allocation5 + $0x1], 1 }

</bundles_post_ra>
